<compile_context>
chip_gen: v5e
topology: v5e:2x2
jax: 0.10.0
libtpu: 0.0.40
codegen_flags: <defaults>
</compile_context>

<pallas_src>
import functools

import jax
import jax.numpy as jnp
from jax.experimental import pallas as pl
from jax.experimental.pallas import tpu as pltpu


def _round_up(x: int, m: int) -> int:
    return ((x + m - 1) // m) * m


def _loss_kernel(out_ref, tgt_ref, w_ref, loss_ref, mse_acc, w_acc, *,
                 c_mse, c_w, n_rays, tile_n, tiles_per_core):
    i = pl.program_id(1)

    @pl.when(i == 0)
    def _init():
        mse_acc[...] = jnp.zeros_like(mse_acc)
        w_acc[...] = jnp.zeros_like(w_acc)

    # --- MSE term: lane-dense (tile_m, 128) slabs; zero padding contributes 0.
    diff = out_ref[...].astype(jnp.float32) - tgt_ref[...].astype(jnp.float32)
    mse_acc[...] += jnp.sum(diff * diff, axis=0, keepdims=True)          # (1,128)

    # --- Weight-accumulation term: per-ray sample sum + asymmetric clamp.
    w = w_ref[...].astype(jnp.float32)
    wsum = jnp.sum(w, axis=1, keepdims=True)                             # (tile_n,1)
    wres = jnp.minimum(wsum, 1.0) - 1.0
    # In-kernel tail mask: rows at/after n_rays (ragged last tile, or a
    # duplicated/clamped tile on the second core) contribute exactly 0.
    row0 = (pl.program_id(0) * tiles_per_core + i) * tile_n
    ray = row0 + jax.lax.broadcasted_iota(jnp.int32, (tile_n, 1), 0)
    wres = jnp.where(ray < n_rays, wres, 0.0)
    w_acc[...] += jnp.sum(wres * wres, axis=0, keepdims=True)            # (1,1)

    @pl.when(i == pl.num_programs(1) - 1)
    def _finalize():
        total = c_mse * jnp.sum(mse_acc[...]) + c_w * jnp.sum(w_acc[...])
        loss_ref[...] = jnp.full(loss_ref.shape, total, dtype=jnp.float32)


def mse_plus_weight_accum(outputs, targets, nerf_weights, loss_alpha, loss_beta,
                          *, tile_n=8192, num_cores=2):
    """Pallas implementation of MSEPlusWeightAccum.forward (returns a scalar)."""
    N, C = outputs.shape
    Nw, S = nerf_weights.shape
    assert targets.shape == (N, C)
    assert Nw == N

    # ----- ray-tile grid -----------------------------------------------------
    tile_n = max(8, min(int(tile_n), _round_up(N, 8)))
    tile_n = _round_up(tile_n, 8)
    w_tiles = pl.cdiv(N, tile_n)                   # real weight tiles (last may be ragged)
    tiles_per_core = pl.cdiv(w_tiles, num_cores)
    total_tiles = tiles_per_core * num_cores
    last_wblock = w_tiles - 1

    # ----- lane-dense slab for the MSE operands ------------------------------
    n_elems = N * C
    tile_m = _round_up(pl.cdiv(n_elems, total_tiles * 128), 8)
    slab_rows = total_tiles * tile_m
    pad_elems = slab_rows * 128 - n_elems

    def to_slab(x):
        flat = x.reshape(-1)
        if pad_elems:
            flat = jnp.pad(flat, (0, pad_elems))   # zero pads -> diff == 0 exactly
        return flat.reshape(slab_rows, 128)

    out_slab = to_slab(outputs)
    tgt_slab = to_slab(targets)

    kernel = functools.partial(
        _loss_kernel,
        c_mse=float(loss_alpha) / float(n_elems),  # alpha / (N*C), trace-time
        c_w=float(loss_beta) / float(N),           # beta  / N,     trace-time
        n_rays=N, tile_n=tile_n, tiles_per_core=tiles_per_core)

    # ----- explicit VMEM budget (double-buffered inputs + headroom) ----------
    lane_s = _round_up(S, 128)                     # VMEM lane padding of the weights tile
    w_bytes = 2 * tile_n * lane_s * nerf_weights.dtype.itemsize
    slab_bytes = 2 * 2 * tile_m * 128 * out_slab.dtype.itemsize
    vmem_limit = int(min(max(w_bytes + slab_bytes + (4 << 20), 32 << 20), 56 << 20))

    def slab_map(c, i):
        return (c * tiles_per_core + i, 0)

    def w_map(c, i):
        # Clamp so a duplicated trailing tile on the second core never starts
        # fully out of bounds; its rows are masked to zero in-kernel.
        return (jnp.minimum(c * tiles_per_core + i, last_wblock), 0)

    partials = pl.pallas_call(
        kernel,
        out_shape=jax.ShapeDtypeStruct((num_cores, 8, 128), jnp.float32),
        grid=(num_cores, tiles_per_core),
        in_specs=[
            pl.BlockSpec((tile_m, 128), slab_map),      # outputs slab
            pl.BlockSpec((tile_m, 128), slab_map),      # targets slab
            pl.BlockSpec((tile_n, S), w_map),           # nerf weights (no host-side pad)
        ],
        out_specs=pl.BlockSpec((1, 8, 128), lambda c, i: (c, 0, 0)),
        scratch_shapes=[
            pltpu.VMEM((1, 128), jnp.float32),   # running sum((outputs-targets)^2), per lane
            pltpu.VMEM((1, 1), jnp.float32),     # running sum((min(wsum,1)-1)^2)
        ],
        compiler_params=pltpu.CompilerParams(
            dimension_semantics=("parallel", "arbitrary"),
            vmem_limit_bytes=vmem_limit),
    )(out_slab, tgt_slab, nerf_weights)

    return jnp.sum(partials[:, 0, 0])


def _reference(outputs, targets, nerf_weights, alpha, beta):
    wsum = jnp.minimum(jnp.sum(nerf_weights, axis=1), 1.0)
    loss_mse = jnp.mean((outputs - targets) ** 2)
    loss_w = jnp.mean((wsum - 1.0) ** 2)
    return alpha * loss_mse + beta * loss_w


if __name__ == "__main__":
    # Deterministic "config": lossAlpha / lossBeta for net_idx = -1.
    loss_alpha = 1.0
    loss_beta = 0.1

    key = jax.random.PRNGKey(0)
    k1, k2, k3, k4, k5, k6 = jax.random.split(key, 6)

    # Case 1: small single-tile shapes.  N < tile_n exercises the clamped
    # duplicate tile on the second slice of the parallel axis (fully masked).
    N1, C1, S1 = 128, 3, 64
    outputs1 = jax.random.normal(k1, (N1, C1), dtype=jnp.float32)
    targets1 = jax.random.normal(k2, (N1, C1), dtype=jnp.float32)
    # nerf weights in [0, 1/32); per-ray sums straddle 1.0 so the clamp matters.
    weights1 = jax.random.uniform(k3, (N1, S1), dtype=jnp.float32) / 32.0

    loss1 = jax.block_until_ready(
        mse_plus_weight_accum(outputs1, targets1, weights1, loss_alpha, loss_beta))
    ref1 = _reference(outputs1, targets1, weights1, loss_alpha, loss_beta)
    assert jnp.allclose(loss1, ref1, rtol=1e-5, atol=1e-6), (loss1, ref1)

    # Case 2: multi-tile grid with a ragged last tile (exercises the in-kernel
    # tail mask, cross-step accumulation and cross-core partial summation).
    N2, C2, S2 = 1000, 3, 64
    outputs2 = jax.random.normal(k4, (N2, C2), dtype=jnp.float32)
    targets2 = jax.random.normal(k5, (N2, C2), dtype=jnp.float32)
    weights2 = jax.random.uniform(k6, (N2, S2), dtype=jnp.float32) / 32.0

    loss2 = jax.block_until_ready(
        mse_plus_weight_accum(outputs2, targets2, weights2, loss_alpha, loss_beta,
                              tile_n=256))
    ref2 = _reference(outputs2, targets2, weights2, loss_alpha, loss_beta)
    assert jnp.allclose(loss2, ref2, rtol=1e-5, atol=1e-6), (loss2, ref2)

    print("KERNEL_OK")
</pallas_src>

<mosaic_0001>
module attributes {stable_mosaic.version = 11 : i64} {
  func.func @_loss_kernel(%arg0: i32, %arg1: i32, %arg2: memref<8x128xf32, #tpu.memory_space<vmem>>, %arg3: memref<8x128xf32, #tpu.memory_space<vmem>>, %arg4: memref<128x64xf32, #tpu.memory_space<vmem>>, %arg5: memref<1x8x128xf32, #tpu.memory_space<vmem>>, %arg6: memref<1x128xf32, #tpu.memory_space<vmem>>, %arg7: memref<1x1xf32, #tpu.memory_space<vmem>>) attributes {dimension_semantics = [#tpu.dimension_semantics<parallel>, #tpu.dimension_semantics<arbitrary>], iteration_bounds = array<i64: 2, 1>, scalar_prefetch = 0 : i64, scratch_operands = 2 : i64, tpu.core_type = #tpu.core_type<tc>, window_params = [{transform_indices = @transform_0, window_bounds = array<i64: 8, 128>}, {transform_indices = @transform_1, window_bounds = array<i64: 8, 128>}, {transform_indices = @transform_2, window_bounds = array<i64: 128, 64>}, {transform_indices = @transform_3, window_bounds = array<i64: 1, 8, 128>}]} {
    %c0_i32 = arith.constant 0 : i32
    %0 = arith.cmpi eq, %arg1, %c0_i32 : i32
    %1 = arith.extui %0 : i1 to i32
    %c0_i32_0 = arith.constant 0 : i32
    %2 = arith.cmpi ne, %1, %c0_i32_0 : i32
    scf.if %2 {
      %cst_22 = arith.constant 0.000000e+00 : f32
      %38 = vector.broadcast %cst_22 : f32 to vector<1x128xf32>
      %c0_23 = arith.constant 0 : index
      %c0_24 = arith.constant 0 : index
      %39 = vector.load %arg6[%c0_23, %c0_24] : memref<1x128xf32, #tpu.memory_space<vmem>>, vector<1x128xf32>
      tpu.vector_store %arg6[%c0_23, %c0_24], %38 {strides = array<i32>} : memref<1x128xf32, #tpu.memory_space<vmem>>, vector<1x128xf32>,
      %cst_25 = arith.constant 0.000000e+00 : f32
      %40 = vector.broadcast %cst_25 : f32 to vector<1x1xf32>
      %c0_26 = arith.constant 0 : index
      %c0_27 = arith.constant 0 : index
      %41 = vector.load %arg7[%c0_26, %c0_27] : memref<1x1xf32, #tpu.memory_space<vmem>>, vector<1x1xf32>
      tpu.vector_store %arg7[%c0_26, %c0_27], %40 {strides = array<i32>} : memref<1x1xf32, #tpu.memory_space<vmem>>, vector<1x1xf32>,
    } else {
    }
    %c0 = arith.constant 0 : index
    %c0_1 = arith.constant 0 : index
    %3 = vector.load %arg2[%c0, %c0_1] : memref<8x128xf32, #tpu.memory_space<vmem>>, vector<8x128xf32>
    %c0_2 = arith.constant 0 : index
    %c0_3 = arith.constant 0 : index
    %4 = vector.load %arg3[%c0_2, %c0_3] : memref<8x128xf32, #tpu.memory_space<vmem>>, vector<8x128xf32>
    %5 = arith.subf %3, %4 : vector<8x128xf32>
    %c0_4 = arith.constant 0 : index
    %c0_5 = arith.constant 0 : index
    %6 = vector.load %arg6[%c0_4, %c0_5] : memref<1x128xf32, #tpu.memory_space<vmem>>, vector<1x128xf32>
    %7 = arith.mulf %5, %5 : vector<8x128xf32>
    %cst = arith.constant dense<0.000000e+00> : vector<128xf32>
    %8 = vector.multi_reduction <add>, %7, %cst [0] : vector<8x128xf32> to vector<128xf32>
    %9 = vector.shape_cast %8 : vector<128xf32> to vector<1x128xf32>
    %10 = arith.addf %6, %9 : vector<1x128xf32>
    %c0_6 = arith.constant 0 : index
    %c0_7 = arith.constant 0 : index
    %11 = vector.load %arg6[%c0_6, %c0_7] : memref<1x128xf32, #tpu.memory_space<vmem>>, vector<1x128xf32>
    tpu.vector_store %arg6[%c0_6, %c0_7], %10 {strides = array<i32>} : memref<1x128xf32, #tpu.memory_space<vmem>>, vector<1x128xf32>,
    %c0_8 = arith.constant 0 : index
    %c0_9 = arith.constant 0 : index
    %12 = vector.load %arg4[%c0_8, %c0_9] : memref<128x64xf32, #tpu.memory_space<vmem>>, vector<128x64xf32>
    %cst_10 = arith.constant dense<0.000000e+00> : vector<128xf32>
    %13 = vector.multi_reduction <add>, %12, %cst_10 [1] : vector<128x64xf32> to vector<128xf32>
    %14 = vector.shape_cast %13 : vector<128xf32> to vector<128x1xf32>
    %cst_11 = arith.constant 1.000000e+00 : f32
    %15 = vector.broadcast %cst_11 : f32 to vector<128x1xf32>
    %16 = arith.minimumf %14, %15 : vector<128x1xf32>
    %cst_12 = arith.constant 1.000000e+00 : f32
    %17 = vector.broadcast %cst_12 : f32 to vector<128x1xf32>
    %18 = arith.subf %16, %17 : vector<128x1xf32>
    %c1_i32 = arith.constant 1 : i32
    %19 = arith.muli %arg0, %c1_i32 : i32
    %20 = arith.addi %19, %arg1 : i32
    %c128_i32 = arith.constant 128 : i32
    %21 = arith.muli %20, %c128_i32 : i32
    %22 = tpu.iota {dimensions = array<i32: 0>} : vector<128x1xi32>
    %23 = vector.broadcast %21 : i32 to vector<128x1xi32>
    %24 = arith.addi %23, %22 : vector<128x1xi32>
    %c128_i32_13 = arith.constant 128 : i32
    %25 = vector.broadcast %c128_i32_13 : i32 to vector<128x1xi32>
    %26 = arith.cmpi slt, %24, %25 : vector<128x1xi32>
    %cst_14 = arith.constant 0.000000e+00 : f32
    %27 = vector.broadcast %cst_14 : f32 to vector<128x1xf32>
    %28 = arith.select %26, %18, %27 : vector<128x1xi1>, vector<128x1xf32>
    %c0_15 = arith.constant 0 : index
    %c0_16 = arith.constant 0 : index
    %29 = vector.load %arg7[%c0_15, %c0_16] : memref<1x1xf32, #tpu.memory_space<vmem>>, vector<1x1xf32>
    %30 = arith.mulf %28, %28 : vector<128x1xf32>
    %cst_17 = arith.constant dense<0.000000e+00> : vector<1xf32>
    %31 = vector.multi_reduction <add>, %30, %cst_17 [0] : vector<128x1xf32> to vector<1xf32>
    %32 = vector.shape_cast %31 : vector<1xf32> to vector<1x1xf32>
    %33 = arith.addf %29, %32 : vector<1x1xf32>
    %c0_18 = arith.constant 0 : index
    %c0_19 = arith.constant 0 : index
    %34 = vector.load %arg7[%c0_18, %c0_19] : memref<1x1xf32, #tpu.memory_space<vmem>>, vector<1x1xf32>
    tpu.vector_store %arg7[%c0_18, %c0_19], %33 {strides = array<i32>} : memref<1x1xf32, #tpu.memory_space<vmem>>, vector<1x1xf32>,
    %c0_i32_20 = arith.constant 0 : i32
    %35 = arith.cmpi eq, %arg1, %c0_i32_20 : i32
    %36 = arith.extui %35 : i1 to i32
    %c0_i32_21 = arith.constant 0 : i32
    %37 = arith.cmpi ne, %36, %c0_i32_21 : i32
    scf.if %37 {
      %c0_22 = arith.constant 0 : index
      %c0_23 = arith.constant 0 : index
      %38 = vector.load %arg6[%c0_22, %c0_23] : memref<1x128xf32, #tpu.memory_space<vmem>>, vector<1x128xf32>
      %39 = vector.shape_cast %38 : vector<1x128xf32> to vector<1x1x128xf32>
      %cst_24 = arith.constant dense<0.000000e+00> : vector<1xf32>
      %40 = vector.multi_reduction <add>, %39, %cst_24 [1, 2] : vector<1x1x128xf32> to vector<1xf32>
      %41 = vector.shape_cast %40 : vector<1xf32> to vector<1x1x1xf32>
      %42 = vector.extract %41[0, 0, 0] : f32 from vector<1x1x1xf32>
      %cst_25 = arith.constant 0.00260416674 : f32
      %43 = arith.mulf %cst_25, %42 : f32
      %c0_26 = arith.constant 0 : index
      %c0_27 = arith.constant 0 : index
      %44 = vector.load %arg7[%c0_26, %c0_27] : memref<1x1xf32, #tpu.memory_space<vmem>>, vector<1x1xf32>
      %45 = vector.shape_cast %44 : vector<1x1xf32> to vector<1x1x1xf32>
      %cst_28 = arith.constant dense<0.000000e+00> : vector<1xf32>
      %46 = vector.multi_reduction <add>, %45, %cst_28 [1, 2] : vector<1x1x1xf32> to vector<1xf32>
      %47 = vector.shape_cast %46 : vector<1xf32> to vector<1x1x1xf32>
      %48 = vector.extract %47[0, 0, 0] : f32 from vector<1x1x1xf32>
      %cst_29 = arith.constant 7.812500e-04 : f32
      %49 = arith.mulf %cst_29, %48 : f32
      %50 = arith.addf %43, %49 : f32
      %51 = vector.broadcast %50 : f32 to vector<1x8x128xf32>
      %c0_30 = arith.constant 0 : index
      %c0_31 = arith.constant 0 : index
      %c0_32 = arith.constant 0 : index
      %52 = vector.load %arg5[%c0_30, %c0_31, %c0_32] : memref<1x8x128xf32, #tpu.memory_space<vmem>>, vector<1x8x128xf32>
      tpu.vector_store %arg5[%c0_30, %c0_31, %c0_32], %51 {strides = array<i32>} : memref<1x8x128xf32, #tpu.memory_space<vmem>>, vector<1x8x128xf32>,
    } else {
    }
    return
  }
  func.func @transform_0(%arg0: i32, %arg1: i32) -> (i32, i32) {
    %c1_i32 = arith.constant 1 : i32
    %0 = arith.muli %arg0, %c1_i32 : i32
    %1 = arith.addi %0, %arg1 : i32
    %c0_i32 = arith.constant 0 : i32
    %c0_i32_0 = arith.constant 0 : i32
    return %1, %c0_i32 : i32, i32
  }
  func.func @transform_1(%arg0: i32, %arg1: i32) -> (i32, i32) {
    %c1_i32 = arith.constant 1 : i32
    %0 = arith.muli %arg0, %c1_i32 : i32
    %1 = arith.addi %0, %arg1 : i32
    %c0_i32 = arith.constant 0 : i32
    %c0_i32_0 = arith.constant 0 : i32
    return %1, %c0_i32 : i32, i32
  }
  func.func @transform_2(%arg0: i32, %arg1: i32) -> (i32, i32) {
    %c1_i32 = arith.constant 1 : i32
    %0 = arith.muli %arg0, %c1_i32 : i32
    %1 = arith.addi %0, %arg1 : i32
    %c0_i32 = arith.constant 0 : i32
    %2 = arith.minsi %1, %c0_i32 : i32
    %c0_i32_0 = arith.constant 0 : i32
    %c0_i32_1 = arith.constant 0 : i32
    return %2, %c0_i32_0 : i32, i32
  }
  func.func @transform_3(%arg0: i32, %arg1: i32) -> (i32, i32, i32) {
    %c0_i32 = arith.constant 0 : i32
    %c0_i32_0 = arith.constant 0 : i32
    %c0_i32_1 = arith.constant 0 : i32
    return %arg0, %c0_i32, %c0_i32_0 : i32, i32, i32
  }
}

</mosaic_0001>

<bundles_post_ra>
// kernel: tpu_custom_call.1
= control target key start
LH: loop header
LB: loop body
LE: loop exit
PB: predicated region body
PF: predicated region fallthrough
CT: control target
= control target key end

     0   :  { %8 = vsyncpa [#allocation5], 0  ;;  %s987_s0 = inlined_call_operand.vmem [shape: f32[16,128], index: 0, kind: input, shape index: {}]   ;;  %s988_s1 = inlined_call_operand.vmem [shape: f32[16,128], index: 1, kind: input, shape index: {}]   ;;  %s989_s2 = inlined_call_operand.vmem [shape: f32[128,64], index: 2, kind: input, shape index: {}]   ;;  %s990_s3 = inlined_call_operand.hbm [shape: f32[2,8,128], index: 3, kind: output, shape index: {}]  }
   0x1   :  { %10 = vsyncpa [#allocation5 + $0x1], 0  ;;  %s800_s12 = smov 0   ;;  %s802_s13 = smov 0  }
   0x2   :  { %s804_s14 = smov 0   ;;  %s806_s15 = smov 0  }
   0x3   :  { %s808_s16 = smov 0   ;;  %s810_s17 = smov 0  }
   0x4 LB: > { %s608_s18 = sadd.s32 4294967295, %s777_s17   ;;  %s609_s19 = sadd.s32 4294967294, %s777_s17   ;;  %s777_s17 = sphi %s810_s17, %s16_s17   ;;  %s773_s16 = sphi %s808_s16, %s997_s16   ;;  %s769_s15 = sphi %s806_s15, %s996_s15   ;;  %s765_s14 = sphi %s804_s14, %s995_s14   ;;  %s761_s13 = sphi %s802_s13, %s994_s13   ;;  %s757_s12 = sphi %s800_s12, %s993_s12  }
   0x5   : > { %s28_s20 = sadd.s32 1, %s773_s16  ;;  %s123_s21 = sadd.s32 1, %s765_s14 }
   0x6   : > { %p30_p0 = scmp.ge.s32.totalorder %s28_s20, 2  ;;  %p133_p1 = scmp.ne.s32.totalorder %s765_s14, %s761_s13 }
   0x7   : > { %p134_p2 = scmp.eq.s32.totalorder %s608_s18, 1  ;;  %p139_p3 = scmp.ne.s32.totalorder %s761_s13, %s757_s12 }
   0x8   : > { %s999_s20 = smov (%p30_p0, %s28_s20), 0  ;;  %p140_p5 = scmp.eq.s32.totalorder %s609_s19, 1 }
   0x9   : > { %p840_p4 = por %p134_p2, %p133_p1  ;;  %s120_s23 = ssub.s32 %s773_s16, %s999_s20 }
   0xa   : > { %p612_p6 = scmp.ge.s32.totalorder %s777_s17, 1  ;;  %p121_p7 = scmp.eq.s32.totalorder %s120_s23, 0 }
   0xb   : > { %p847_p8 = por %p140_p5, %p139_p3  ;;  %p191_p9 = scmp.lt.s32.totalorder %s777_s17, 3 }
   0xc   : > { %s853_s25 = scalar_select %p121_p7, %s765_s14, %s123_s21  }
   0xd   : > { %p192_p10 = pnand %p612_p6, %p191_p9 }
   0xe   : > { %p241_p11 = scmp.lt.s32.totalorder (!%p192_p10), %s769_s15, 0  ;;  %p229_p12 = scmp.lt.s32.totalorder (!%p192_p10), %s769_s15, 1 }
   0xf   : > { %195 = sbr.rel (%p192_p10) target bundleno = 275 (0x113), region = 32  ;;  %s634_s19 = sshll.u32 (!%p192_p10), %s769_s15, 7 }
  0x10   : > { %s225_s21 = sand.u32 (!%p192_p10), 1, %s761_s13  }
  0x11   : > { %s613_s23 = sshll.u32 (!%p192_p10), %s225_s21, 3  ;;  %s502_s11 = scalar_lea.sflag (!%p192_p10), [#allocation5], %s225_s21 }
  0x12   : > { %s227_s4 = scalar_lea.vmem (!%p192_p10), [#allocation4], %s613_s23 }
  0x14   : > { %s242_s26 = scalar_select %p241_p11, %s769_s15, 0  ;;  %vm288_vm0 = vcmask 523264   ;;  %v779_v13 = vmov 0.0   ;;  %vm482_vm1 = vcmask 1040384   ;;  %v371_v47 = vlaneseq }
  0x15   : > { %s230_s27 = scalar_select %p229_p12, %s769_s15, 1  ;;  %256 = vst [vmem:[#allocation2] sm:$0x1] %v779_v13  ;;  %v906_v49 = vstv %s634_s19  ;;  %vm257_vm6 = vcmask 0  }
  0x16   : > { %s616_s28 = sshll.u32 %s242_s26, 4  ;;  %v904_v48 = vshrl.u32 %v371_v47, 7  ;;  %258 = vst.msk [vmem:[#allocation3] sm:$0x1] %vm257_vm6, %v779_v13  ;;  %s636_s26 = sshll.u32 %s769_s15, 3 }
  0x17   : > { %p244_p13 = scmp.lt.s32.totalorder %s616_s28, 15  ;;  %s614_s29 = sshll.u32 %s230_s27, 3 }
  0x18   : > { %s232_s5 = scalar_lea.vmem %s987_s0, %s614_s29  ;;  %s238_s8 = scalar_lea.vmem %s988_s1, %s614_s29  ;;  %v374_v51 = vadd.s32 16, %v904_v48  ;;  %v373_v54 = vadd.s32 8, %v904_v48  ;;  %v375_v55 = vadd.s32 24, %v904_v48  ;;  %v389_v56 = vadd.s32 %v906_v49, %v904_v48 }
  0x19   : > { %s1001_s28 = smov (!%p244_p13, %s616_s28), 15  ;;  %v259_v0 = vld [vmem:[%s232_s5] sm:$0xff]  ;;  %v376_v59 = vadd.s32 32, %v904_v48  ;;  %v377_v63 = vadd.s32 40, %v904_v48  ;;  %v383_v47 = vadd.s32 88, %v904_v48  ;;  %s512_s30 = scalar_lea.hbm %s990_s3, %s636_s26 }
  0x1a   : > { %v260_v1 = vld [vmem:[%s238_s8] sm:$0xff]  ;;  %s617_s9 = sshll.u32 %s1001_s28, 3  ;;  %v391_v58 = vadd.s32 %v906_v49, %v374_v51  ;;  %v390_v61 = vadd.s32 %v906_v49, %v373_v54  ;;  %v392_v62 = vadd.s32 %v906_v49, %v375_v55  ;;  %vm405_vm2 = vcmp.lt.s32.totalorder %v389_v56, 128  ;;  %s514_s5 = sshll.u32 %s227_s4, 4  ;;  %s515_s5 = int_to_ptr.vmem [resolvable:$true] %s514_s5 }
  0x1b   : > { %v261_v2 = vsub.f32 %v259_v0, %v260_v1  ;;  %s868_s18 = scalar_lea.vmem %s989_s2, %s617_s9  ;;  %v393_v1 = vadd.s32 %v906_v49, %v376_v59  ;;  %s516_s9 = sshll.u32 %s512_s30, 4  ;;  %s517_s9 = int_to_ptr.hbm [resolvable:$true] %s516_s9 }
  0x1c   : > { %v272_v3 = vld [vmem:[%s868_s18] sm:$0xff]  ;;  %v274_v4 = vld [vmem:[%s868_s18 + $0x10] sm:$0xff]  ;;  %v273_v10 = vld [vmem:[%s868_s18 + $0x8] sm:$0xff]  ;;  %vm407_vm3 = vcmp.lt.s32.totalorder %v391_v58, 128  ;;  %vm406_vm4 = vcmp.lt.s32.totalorder %v390_v61, 128  ;;  %vm408_vm5 = vcmp.lt.s32.totalorder %v392_v62, 128  ;;  %v400_v61 = vadd.s32 %v906_v49, %v383_v47 }
  0x1d   : > { %v276_v5 = vld [vmem:[%s868_s18 + $0x20] sm:$0xff]  ;;  %v289_v6 = vsel %vm288_vm0, %v272_v3, 0.0  ;;  %v295_v7 = vsel %vm288_vm0, %v274_v4, 0.0  ;;  %v263_v9 = vmul.f32 %v261_v2, %v261_v2  ;;  %v275_v11 = vld [vmem:[%s868_s18 + $0x18] sm:$0xff]  ;;  %v277_v12 = vld [vmem:[%s868_s18 + $0x28] sm:$0xff]  ;;  %v292_v15 = vsel %vm288_vm0, %v273_v10, 0.0 }
  0x1e   : > { %v301_v8 = vsel %vm288_vm0, %v276_v5, 0.0  ;;  %290 = vadd.xlane.f32.xlu0 %v289_v6  ;;  %296 = vadd.xlane.f32.xlu1 %v295_v7  ;;  %v298_v16 = vsel %vm288_vm0, %v275_v11, 0.0  ;;  %v304_v17 = vsel %vm288_vm0, %v277_v12, 0.0  ;;  %v278_v20 = vld [vmem:[%s868_s18 + $0x30] sm:$0xff]  ;;  %v279_v21 = vld [vmem:[%s868_s18 + $0x38] sm:$0xff]  ;;  %v280_v23 = vld [vmem:[%s868_s18 + $0x40] sm:$0xff]  ;;  %v394_v11 = vadd.s32 %v906_v49, %v377_v63 }
  0x1f   : > { %302 = vadd.xlane.f32.xlu2 %v301_v8  ;;  %v264_v14 = vrot.slane %v263_v9, 4  ;;  %v307_v25 = vsel %vm288_vm0, %v278_v20, 0.0  ;;  %v310_v26 = vsel %vm288_vm0, %v279_v21, 0.0  ;;  %v262_v27 = vld [vmem:[#allocation2] sm:$0x1]  ;;  %v313_v28 = vsel %vm288_vm0, %v280_v23, 0.0 }
  0x20   : > { %v281_v31 = vld [vmem:[%s868_s18 + $0x48] sm:$0xff]  ;;  %v282_v32 = vld [vmem:[%s868_s18 + $0x50] sm:$0xff]  ;;  %v283_v33 = vld [vmem:[%s868_s18 + $0x58] sm:$0xff]  ;;  %v378_v4 = vadd.s32 48, %v904_v48  ;;  %v379_v5 = vadd.s32 56, %v904_v48  ;;  %v380_v12 = vadd.s32 64, %v904_v48 }
  0x21   : > { %v265_v18 = vadd.f32 %v264_v14, %v263_v9  ;;  %v316_v34 = vsel %vm288_vm0, %v281_v31, 0.0  ;;  %v319_v35 = vsel %vm288_vm0, %v282_v32, 0.0  ;;  %v322_v36 = vsel %vm288_vm0, %v283_v33, 0.0  ;;  %v284_v37 = vld [vmem:[%s868_s18 + $0x60] sm:$0xff]  ;;  %v285_v38 = vld [vmem:[%s868_s18 + $0x68] sm:$0xff]  ;;  %v286_v39 = vld [vmem:[%s868_s18 + $0x70] sm:$0xff] }
  0x22   : > { %v325_v40 = vsel %vm288_vm0, %v284_v37, 0.0  ;;  %v328_v41 = vsel %vm288_vm0, %v285_v38, 0.0  ;;  %v331_v42 = vsel %vm288_vm0, %v286_v39, 0.0  ;;  %v287_v43 = vld [vmem:[%s868_s18 + $0x78] sm:$0xff]  ;;  %vm409_vm7 = vcmp.lt.s32.totalorder %v393_v1, 128  ;;  %s713_s18 = sshra.s32 %s517_s9, 4  ;;  %s714_s18 = int_to_ptr.hbm [resolvable:$true] %s713_s18 }
  0x23   : > { %v266_v19 = vrot.slane %v265_v18, 2  ;;  %v334_v45 = vsel %vm288_vm0, %v287_v43, 0.0  ;;  %vm410_vm8 = vcmp.lt.s32.totalorder %v394_v11, 128  ;;  %v382_v39 = vadd.s32 80, %v904_v48  ;;  %s715_s15 = scalar_lea.hbm %s714_s18, 8  ;;  %s719_s26 = scalar_lea.hbm %s990_s3, 16 }
  0x24   : > { %v384_v1 = vadd.s32 96, %v904_v48  ;;  %vm416_vm14 = vcmp.lt.s32.totalorder %v400_v61, 128  ;;  %p716_p0 = scmp.ne.s32.totalorder %s714_s18, %s715_s15  ;;  %p720_p3 = scmp.lt.s32.totalorder %s714_s18, %s990_s3 }
  0x25   : > { %v267_v22 = vadd.f32 %v266_v19, %v265_v18  ;;  %v395_v18 = vadd.s32 %v906_v49, %v378_v4  ;;  %v396_v19 = vadd.s32 %v906_v49, %v379_v5  ;;  %v399_v54 = vadd.s32 %v906_v49, %v382_v39  ;;  %p721_p5 = scmp.lt.s32.totalorder %s719_s26, %s715_s15 }
  0x26   : > { %293 = vadd.xlane.f32.xlu0 %v292_v15  ;;  %299 = vadd.xlane.f32.xlu1 %v298_v16  ;;  %p717_p1 = pnand %p716_p0, %p840_p4 }
  0x27   : > { %305 = vadd.xlane.f32.xlu2 %v304_v17  ;;  %v268_v24 = vrot.slane %v267_v22, 1  ;;  %vm411_vm9 = vcmp.lt.s32.totalorder %v395_v18, 128  ;;  %vm412_vm10 = vcmp.lt.s32.totalorder %v396_v19, 128  ;;  %vm415_vm13 = vcmp.lt.s32.totalorder %v399_v54, 128  ;;  %p722_p6 = por %p721_p5, %p720_p3 }
  0x28   : > { %p718_p2 = pneg %p717_p1 }
  0x29   : > { %v269_v29 = vadd.f32 %v268_v24, %v267_v22 }
  0x2a   : > { %p723_p7 = pnand %p722_p6, %p718_p2 }
  0x2b   : > { %v270_v30 = vadd.f32 %v269_v29, %v262_v27 }
  0x2d   : > { %271 = vst [vmem:[#allocation2] sm:$0x1] %v270_v30 }
  0x2e   : > { %308 = vadd.xlane.f32.xlu0 %v307_v25  ;;  %311 = vadd.xlane.f32.xlu1 %v310_v26  ;;  %v397_v26 = vadd.s32 %v906_v49, %v380_v12 }
  0x2f   : > { %314 = vadd.xlane.f32.xlu2 %v313_v28  ;;  %v381_v28 = vadd.s32 72, %v904_v48 }
  0x30   : > { %vm413_vm11 = vcmp.lt.s32.totalorder %v397_v26, 128 }
  0x31   : > { %v398_v43 = vadd.s32 %v906_v49, %v381_v28 }
  0x33   : > { %vm414_vm12 = vcmp.lt.s32.totalorder %v398_v43, 128 }
  0x34   : > { %v481_v44 = vld [vmem:[#allocation2] sm:$0x1] }
  0x35   : > { %v483_v46 = vsel %vm482_vm1, %v481_v44, 0.0 }
  0x36   : > { %317 = vadd.xlane.f32.xlu0 %v316_v34  ;;  %320 = vadd.xlane.f32.xlu1 %v319_v35 }
  0x37   : > { %323 = vadd.xlane.f32.xlu2 %v322_v36 }
  0x3e   : > { %326 = vadd.xlane.f32.xlu0 %v325_v40  ;;  %329 = vadd.xlane.f32.xlu1 %v328_v41 }
  0x3f   : > { %332 = vadd.xlane.f32.xlu2 %v331_v42 }
  0x46   : > { %335 = vadd.xlane.f32.xlu0 %v334_v45  ;;  %484 = vadd.xlane.f32.xlu1 %v483_v46 }
  0x91   : > { %v291_v50 = vpop.xlane.xlu0 %290  ;;  %v297_v52 = vpop.xlane.xlu1 %296 }
  0x92   : > { %v303_v53 = vpop.xlane.xlu2 %302  ;;  %v337_v57 = vmin.f32 %v291_v50, 1.0  ;;  %v339_v60 = vmin.f32 %v297_v52, 1.0 }
  0x93   : > { %v341_v7 = vmin.f32 %v303_v53, 1.0 }
  0x94   : > { %v618_v0 = vadd.f32 -1.0, %v337_v57  ;;  %v620_v6 = vadd.f32 -1.0, %v339_v60 }
  0x95   : > { %v622_v21 = vadd.f32 -1.0, %v341_v7 }
  0x96   : > { %v421_v14 = vsel %vm405_vm2, %v618_v0, 0.0  ;;  %v423_v20 = vsel %vm407_vm3, %v620_v6, 0.0 }
  0x97   : > { %v438_v24 = vmul.f32 %v421_v14, %v421_v14  ;;  %v440_v29 = vmul.f32 %v423_v20, %v423_v20  ;;  %v425_v34 = vsel %vm409_vm7, %v622_v21, 0.0  ;;  %v401_v14 = vadd.s32 %v906_v49, %v384_v1 }
  0x98   : > { %v442_v44 = vmul.f32 %v425_v34, %v425_v34 }
  0x99   : > { %v294_v2 = vpop.xlane.xlu0 %293  ;;  %v300_v3 = vpop.xlane.xlu1 %299  ;;  %vm417_vm15 = vcmp.lt.s32.totalorder %v401_v14, 128 }
  0x9a   : > { %v338_v8 = vmin.f32 %v294_v2, 1.0  ;;  %v340_v9 = vmin.f32 %v300_v3, 1.0  ;;  %v306_v10 = vpop.xlane.xlu2 %305  ;;  %v385_v2 = vadd.s32 104, %v904_v48 }
  0x9b   : > { %v342_v17 = vmin.f32 %v306_v10, 1.0  ;;  %v386_v10 = vadd.s32 112, %v904_v48 }
  0x9c   : > { %v619_v15 = vadd.f32 -1.0, %v338_v8  ;;  %v621_v16 = vadd.f32 -1.0, %v340_v9 }
  0x9d   : > { %v623_v27 = vadd.f32 -1.0, %v342_v17 }
  0x9e   : > { %v422_v22 = vsel %vm406_vm4, %v619_v15, 0.0  ;;  %v424_v23 = vsel %vm408_vm5, %v621_v16, 0.0  ;;  %v402_v15 = vadd.s32 %v906_v49, %v385_v2 }
  0x9f   : > { %v439_v25 = vmul.f32 %v422_v22, %v422_v22  ;;  %v441_v31 = vmul.f32 %v424_v23, %v424_v23  ;;  %v426_v40 = vsel %vm410_vm8, %v623_v27, 0.0  ;;  %v403_v23 = vadd.s32 %v906_v49, %v386_v10 }
  0xa0   : > { %v443_v52 = vmul.f32 %v426_v40, %v426_v40  ;;  %vm418_vm0 = vcmp.lt.s32.totalorder %v402_v15, 128 }
  0xa1   : > { %v454_v30 = vadd.f32 %v439_v25, %v438_v24  ;;  %v309_v32 = vpop.xlane.xlu0 %308  ;;  %v312_v33 = vpop.xlane.xlu1 %311  ;;  %vm419_vm1 = vcmp.lt.s32.totalorder %v403_v23, 128 }
  0xa2   : > { %v343_v35 = vmin.f32 %v309_v32, 1.0  ;;  %v344_v36 = vmin.f32 %v312_v33, 1.0  ;;  %v315_v13 = vpop.xlane.xlu2 %314 }
  0xa3   : > { %v455_v37 = vadd.f32 %v454_v30, %v440_v29  ;;  %v345_v38 = vmin.f32 %v315_v13, 1.0  ;;  %v387_v30 = vadd.s32 120, %v904_v48 }
  0xa4   : > { %v624_v41 = vadd.f32 -1.0, %v343_v35  ;;  %v625_v42 = vadd.f32 -1.0, %v344_v36 }
  0xa5   : > { %v456_v45 = vadd.f32 %v455_v37, %v441_v31  ;;  %v626_v46 = vadd.f32 -1.0, %v345_v38  ;;  %v404_v38 = vadd.s32 %v906_v49, %v387_v30 }
  0xa6   : > { %v427_v50 = vsel %vm411_vm9, %v624_v41, 0.0  ;;  %v428_v51 = vsel %vm412_vm10, %v625_v42, 0.0 }
  0xa7   : > { %v457_v53 = vadd.f32 %v456_v45, %v442_v44  ;;  %v429_v55 = vsel %vm413_vm11, %v626_v46, 0.0  ;;  %v444_v57 = vmul.f32 %v427_v50, %v427_v50  ;;  %v445_v58 = vmul.f32 %v428_v51, %v428_v51 }
  0xa8   : > { %v446_v4 = vmul.f32 %v429_v55, %v429_v55  ;;  %vm420_vm2 = vcmp.lt.s32.totalorder %v404_v38, 128 }
  0xa9   : > { %v458_v56 = vadd.f32 %v457_v53, %v443_v52  ;;  %v318_v59 = vpop.xlane.xlu0 %317  ;;  %v321_v60 = vpop.xlane.xlu1 %320 }
  0xaa   : > { %v346_v62 = vmin.f32 %v318_v59, 1.0  ;;  %v347_v63 = vmin.f32 %v321_v60, 1.0  ;;  %v324_v0 = vpop.xlane.xlu2 %323 }
  0xab   : > { %v459_v3 = vadd.f32 %v458_v56, %v444_v57  ;;  %v348_v5 = vmin.f32 %v324_v0, 1.0 }
  0xac   : > { %v627_v6 = vadd.f32 -1.0, %v346_v62  ;;  %v628_v7 = vadd.f32 -1.0, %v347_v63  ;;  %v437_v62 = vld [vmem:[#allocation3] sm:$0x1] }
  0xad   : > { %v460_v8 = vadd.f32 %v459_v3, %v445_v58  ;;  %v629_v9 = vadd.f32 -1.0, %v348_v5 }
  0xae   : > { %v430_v11 = vsel %vm414_vm12, %v627_v6, 0.0  ;;  %v431_v12 = vsel %vm415_vm13, %v628_v7, 0.0 }
  0xaf   : > { %v461_v16 = vadd.f32 %v460_v8, %v446_v4  ;;  %v447_v17 = vmul.f32 %v430_v11, %v430_v11  ;;  %v448_v18 = vmul.f32 %v431_v12, %v431_v12  ;;  %v432_v19 = vsel %vm416_vm14, %v629_v9, 0.0 }
  0xb0   : > { %v449_v28 = vmul.f32 %v432_v19, %v432_v19 }
  0xb1   : > { %v462_v20 = vadd.f32 %v461_v16, %v447_v17  ;;  %v327_v21 = vpop.xlane.xlu0 %326  ;;  %v330_v22 = vpop.xlane.xlu1 %329 }
  0xb2   : > { %v349_v24 = vmin.f32 %v327_v21, 1.0  ;;  %v350_v25 = vmin.f32 %v330_v22, 1.0  ;;  %v333_v26 = vpop.xlane.xlu2 %332 }
  0xb3   : > { %v463_v27 = vadd.f32 %v462_v20, %v448_v18  ;;  %v351_v29 = vmin.f32 %v333_v26, 1.0 }
  0xb4   : > { %v630_v31 = vadd.f32 -1.0, %v349_v24  ;;  %v631_v32 = vadd.f32 -1.0, %v350_v25 }
  0xb5   : > { %v632_v33 = vadd.f32 -1.0, %v351_v29  ;;  %v464_v36 = vadd.f32 %v463_v27, %v449_v28 }
  0xb6   : > { %v433_v34 = vsel %vm417_vm15, %v630_v31, 0.0  ;;  %v434_v35 = vsel %vm418_vm0, %v631_v32, 0.0 }
  0xb7   : > { %v450_v13 = vmul.f32 %v433_v34, %v433_v34  ;;  %v451_v37 = vmul.f32 %v434_v35, %v434_v35  ;;  %v435_v39 = vsel %vm419_vm1, %v632_v33, 0.0 }
  0xb8   : > { %v452_v46 = vmul.f32 %v435_v39, %v435_v39 }
  0xb9   : > { %v465_v40 = vadd.f32 %v464_v36, %v450_v13  ;;  %v336_v41 = vpop.xlane.xlu0 %335  ;;  %v485_v42 = vpop.xlane.xlu1 %484 }
  0xba   : > { %v352_v43 = vmin.f32 %v336_v41, 1.0  ;;  %v486_v44 = vrot.slane %v485_v42, 4 }
  0xbb   : > { %v466_v45 = vadd.f32 %v465_v40, %v451_v37 }
  0xbc   : > { %v633_v48 = vadd.f32 -1.0, %v352_v43  ;;  %v487_v47 = vadd.f32 %v486_v44, %v485_v42 }
  0xbd   : > { %v467_v52 = vadd.f32 %v466_v45, %v452_v46 }
  0xbe   : > { %v436_v50 = vsel %vm420_vm2, %v633_v48, 0.0  ;;  %v488_v51 = vrot.slane %v487_v47, 2 }
  0xbf   : > { %v453_v53 = vmul.f32 %v436_v50, %v436_v50 }
  0xc0   : > { %v489_v54 = vadd.f32 %v488_v51, %v487_v47 }
  0xc1   : > { %v468_v55 = vadd.f32 %v467_v52, %v453_v53 }
  0xc2   : > { %v490_v56 = vrot.slane %v489_v54, 1 }
  0xc3   : > { %v469_v49 = vrot.slane %v468_v55, 4 }
  0xc4   : > { %v491_v57 = vadd.f32 %v490_v56, %v489_v54 }
  0xc5   : > { %v470_v58 = vadd.f32 %v469_v49, %v468_v55 }
  0xc6   : > { %639 = vpush %v491_v57 }
  0xc7   : > { %v471_v59 = vrot.slane %v470_v58, 2 }
  0xc9   : > { %v472_v60 = vadd.f32 %v471_v59, %v470_v58 }
  0xcb   : > { %v473_v61 = vrot.slane %v472_v60, 1 }
  0xcd   : > { %v474_v63 = vadd.f32 %v473_v61, %v472_v60 }
  0xcf   : > { %v475_v0 = vadd.f32 %v474_v63, %v437_v62 }
  0xd1   : > { %477 = vst.msk [vmem:[#allocation3] sm:$0x1] %vm257_vm6, %v475_v0 }
  0xd8   : > { %v494_v1 = vld [vmem:[#allocation3] sm:$0x1] }
  0xd9   : > { %641 = vpush %v494_v1 }
  0xf7   : > { %s640_s27 = spop %639 }
  0xf8   : > { %s493_s6 = smul.f32 0.0026041667, %s640_s27 }
 0x10a   : > { %s642_s7 = spop %641 }
 0x10b   : > { %s497_s8 = smul.f32 0.00078125, %s642_s7 }
 0x10d   : > { %s498_s10 = sadd.f32 %s497_s8, %s493_s6 }
 0x10f   : > { %v499_v2 = vstv %s498_s10 }
 0x110   : > { %500 = vst [vmem:[%s227_s4] sm:$0xff] %v499_v2 }
 0x111   : > { %726 = shalt.err (!%p723_p7)
}
 0x112   : > { %643 = dma.vmem_to_hbm [thread:$0]  (%p840_p4), %s515_s5, 128, %s517_s9, %s502_s11  }
 0x113 PF: > { %p649_p9 = scmp.ge.s32.totalorder %s777_s17, 2  ;;  %s528_s21 = sand.u32 1, %s757_s12  }
 0x114   : > { %s529_s29 = scalar_lea.sflag [#allocation5], %s528_s21 }
 0x115   : > { %p646_p10 = pnand %p649_p9, %p847_p8 }
 0x117   : > { %p647_p11 = pneg %p646_p10 }
 0x119   : > { %752 = dma.done.wait (%p647_p11), %s529_s29, 128  }
 0x11a   : > { %754 = vsyncadd (%p647_p11), %s529_s29, 4294967168  ;;  %s16_s17 = sadd.s32 1, %s777_s17   ;;  %s993_s12 = smov %s761_s13 }
 0x11b   : > { %p13_p12 = scmp.ge.s32.totalorder %s16_s17, 4   ;;  %s994_s13 = smov %s765_s14 }
 0x11c   : > { %s995_s14 = smov %s853_s25  ;;  %s996_s15 = smov %s773_s16 }
 0x11d   : > { %s997_s16 = smov %s999_s20  ;;  %15 = sbr.rel (!%p13_p12) target bundleno = 4 (0x4), region = 81 }
 0x122   :  { %535 = vsyncpa [#allocation5], 1 }
 0x123   :  { %537 = vsyncpa [#allocation5 + $0x1], 1 }

</bundles_post_ra>
